<compile_context>
chip_gen: v7x
topology: tpu7x:2x2x1
jax: 0.10.0
libtpu: 0.0.40
codegen_flags: <defaults>
</compile_context>

<pallas_src>
import jax
import jax.numpy as jnp
from jax.experimental import pallas as pl
from jax.experimental.pallas import tpu as pltpu

INPUT_MEAN = [0.2788, 0.2657, 0.2629]
INPUT_STD = [0.2064, 0.1944, 0.2252]

_C = 3
# Fold (x - mean) / std into a single FMA per channel: x * scale + bias.
_SCALE = tuple(float(1.0 / s) for s in INPUT_STD)
_BIAS = tuple(float(-m / s) for m, s in zip(INPUT_MEAN, INPUT_STD))


def _normalize_kernel(x_ref, o_ref):
    # x_ref / o_ref: VMEM (1, C, CHUNK) — one batch element, one H*W chunk.
    # Per-channel constants are compile-time Python floats -> vreg splats.
    for ch in range(_C):
        o_ref[:, ch : ch + 1, :] = (
            x_ref[:, ch : ch + 1, :] * _SCALE[ch] + _BIAS[ch]
        )


def _pick_chunk(hw: int, max_lanes: int = 2048) -> int:
    """Largest multiple-of-128 divisor of hw that is <= max_lanes.

    Falls back to the full H*W extent (always a legal block: equals the full
    array dim) when hw is small or not a multiple of 128.
    """
    if hw <= max_lanes or hw % 128 != 0:
        return hw
    for cand in range(max_lanes - (max_lanes % 128), 127, -128):
        if hw % cand == 0:
            return cand
    return hw  # unreachable (128 always divides hw here), kept for safety


def cnn_planner_forward(image: jax.Array, n_waypoints: int = 3) -> jax.Array:
    """Pallas implementation of CNNPlanner.forward up to the point the
    reference raises NotImplementedError.

    Args:
        image: float32 array of shape (b, 3, h, w), values in [0, 1].

    Returns:
        Normalized image of shape (b, 3, h, w) — the result of the only
        computation defined by the reference forward.
    """
    b, c, h, w = image.shape
    assert c == _C, "CNNPlanner expects 3-channel RGB input"
    hw = h * w

    # Lane-dense view: last axis = H*W, chunked along lanes in %128 blocks.
    x = image.reshape(b, c, hw)
    chunk = _pick_chunk(hw)
    n_chunks = hw // chunk

    normalized = pl.pallas_call(
        _normalize_kernel,
        out_shape=jax.ShapeDtypeStruct((b, c, hw), jnp.float32),
        grid_spec=pltpu.PrefetchScalarGridSpec(
            num_scalar_prefetch=0,
            grid=(b, n_chunks),
            in_specs=[
                pl.BlockSpec((1, c, chunk), lambda bi, ci: (bi, 0, ci)),
            ],
            out_specs=pl.BlockSpec((1, c, chunk), lambda bi, ci: (bi, 0, ci)),
        ),
        compiler_params=pltpu.CompilerParams(
            dimension_semantics=("parallel", "parallel")
        ),
    )(x)

    # TODO(synk): the reference forward raises NotImplementedError here — no
    # CNN backbone or waypoint head producing (b, n_waypoints, 2) is defined
    # in the module. When one is added, fold this normalization into its first
    # conv layer's weights/bias instead of paying a standalone HBM round trip.
    return normalized.reshape(b, c, h, w)


if __name__ == "__main__":
    key = jax.random.PRNGKey(0)
    # image: (b=2, c=3, h=16, w=16), values in [0, 1], float32 (NCHW like PyTorch)
    image = jax.random.uniform(key, (2, 3, 16, 16), dtype=jnp.float32)

    # Plain-JAX reference of the normalization.
    mean = jnp.asarray(INPUT_MEAN, dtype=jnp.float32)[None, :, None, None]
    std = jnp.asarray(INPUT_STD, dtype=jnp.float32)[None, :, None, None]
    ref = jax.block_until_ready((image - mean) / std)

    out = cnn_planner_forward(image, n_waypoints=3)
    out = jax.block_until_ready(out)

    assert out.shape == image.shape and out.dtype == jnp.float32
    assert jnp.allclose(out, ref, atol=1e-5, rtol=1e-5)

    print("KERNEL_OK")
</pallas_src>

<mosaic_0001>
module attributes {stable_mosaic.version = 11 : i64} {
  func.func @_normalize_kernel(%arg0: i32, %arg1: i32, %arg2: memref<1x3x256xf32, #tpu.memory_space<vmem>>, %arg3: memref<1x3x256xf32, #tpu.memory_space<vmem>>) attributes {dimension_semantics = [#tpu.dimension_semantics<parallel>, #tpu.dimension_semantics<parallel>], iteration_bounds = array<i64: 2, 1>, scalar_prefetch = 0 : i64, scratch_operands = 0 : i64, tpu.core_type = #tpu.core_type<tc>, window_params = [{transform_indices = @transform_0, window_bounds = array<i64: 1, 3, 256>}, {transform_indices = @transform_1, window_bounds = array<i64: 1, 3, 256>}]} {
    %c0 = arith.constant 0 : index
    %c0_0 = arith.constant 0 : index
    %c0_1 = arith.constant 0 : index
    %0 = vector.load %arg2[%c0, %c0_0, %c0_1] : memref<1x3x256xf32, #tpu.memory_space<vmem>>, vector<1x1x256xf32>
    %cst = arith.constant 4.84496117 : f32
    %1 = vector.broadcast %cst : f32 to vector<1x1x256xf32>
    %2 = arith.mulf %0, %1 : vector<1x1x256xf32>
    %cst_2 = arith.constant -1.35077524 : f32
    %3 = vector.broadcast %cst_2 : f32 to vector<1x1x256xf32>
    %4 = arith.addf %2, %3 : vector<1x1x256xf32>
    %c0_3 = arith.constant 0 : index
    %c0_4 = arith.constant 0 : index
    %c0_5 = arith.constant 0 : index
    %5 = vector.load %arg3[%c0_3, %c0_4, %c0_5] : memref<1x3x256xf32, #tpu.memory_space<vmem>>, vector<1x1x256xf32>
    tpu.vector_store %arg3[%c0_3, %c0_4, %c0_5], %4 {strides = array<i32>} : memref<1x3x256xf32, #tpu.memory_space<vmem>>, vector<1x1x256xf32>,
    %c0_6 = arith.constant 0 : index
    %c1 = arith.constant 1 : index
    %c0_7 = arith.constant 0 : index
    %6 = vector.load %arg2[%c0_6, %c1, %c0_7] : memref<1x3x256xf32, #tpu.memory_space<vmem>>, vector<1x1x256xf32>
    %cst_8 = arith.constant 5.14403296 : f32
    %7 = vector.broadcast %cst_8 : f32 to vector<1x1x256xf32>
    %8 = arith.mulf %6, %7 : vector<1x1x256xf32>
    %cst_9 = arith.constant -1.36676955 : f32
    %9 = vector.broadcast %cst_9 : f32 to vector<1x1x256xf32>
    %10 = arith.addf %8, %9 : vector<1x1x256xf32>
    %c0_10 = arith.constant 0 : index
    %c1_11 = arith.constant 1 : index
    %c0_12 = arith.constant 0 : index
    %11 = vector.load %arg3[%c0_10, %c1_11, %c0_12] : memref<1x3x256xf32, #tpu.memory_space<vmem>>, vector<1x1x256xf32>
    tpu.vector_store %arg3[%c0_10, %c1_11, %c0_12], %10 {strides = array<i32>} : memref<1x3x256xf32, #tpu.memory_space<vmem>>, vector<1x1x256xf32>,
    %c0_13 = arith.constant 0 : index
    %c2 = arith.constant 2 : index
    %c0_14 = arith.constant 0 : index
    %12 = vector.load %arg2[%c0_13, %c2, %c0_14] : memref<1x3x256xf32, #tpu.memory_space<vmem>>, vector<1x1x256xf32>
    %cst_15 = arith.constant 4.4404974 : f32
    %13 = vector.broadcast %cst_15 : f32 to vector<1x1x256xf32>
    %14 = arith.mulf %12, %13 : vector<1x1x256xf32>
    %cst_16 = arith.constant -1.1674068 : f32
    %15 = vector.broadcast %cst_16 : f32 to vector<1x1x256xf32>
    %16 = arith.addf %14, %15 : vector<1x1x256xf32>
    %c0_17 = arith.constant 0 : index
    %c2_18 = arith.constant 2 : index
    %c0_19 = arith.constant 0 : index
    %17 = vector.load %arg3[%c0_17, %c2_18, %c0_19] : memref<1x3x256xf32, #tpu.memory_space<vmem>>, vector<1x1x256xf32>
    tpu.vector_store %arg3[%c0_17, %c2_18, %c0_19], %16 {strides = array<i32>} : memref<1x3x256xf32, #tpu.memory_space<vmem>>, vector<1x1x256xf32>,
    return
  }
  func.func @transform_0(%arg0: i32, %arg1: i32) -> (i32, i32, i32) {
    %c0_i32 = arith.constant 0 : i32
    %c0_i32_0 = arith.constant 0 : i32
    return %arg0, %c0_i32, %arg1 : i32, i32, i32
  }
  func.func @transform_1(%arg0: i32, %arg1: i32) -> (i32, i32, i32) {
    %c0_i32 = arith.constant 0 : i32
    %c0_i32_0 = arith.constant 0 : i32
    return %arg0, %c0_i32, %arg1 : i32, i32, i32
  }
}

</mosaic_0001>

<bundles_post_ra>
// kernel: tpu_custom_call.1
= control target key start
LH: loop header
LB: loop body
LE: loop exit
PB: predicated region body
PF: predicated region fallthrough
CT: control target
= control target key end

     0   :  { %s338_s6 = smov 0   ;;  %s340_s7 = smov 0   ;;  %s368_s0 = inlined_call_operand.vmem [shape: f32[2,3,256], index: 0, kind: input, shape index: {}]   ;;  %s369_s1 = inlined_call_operand.vmem [shape: f32[2,3,256], index: 1, kind: output, shape index: {}]  }
   0x1   :  { %s342_s8 = smov 0  }
   0x2 LB: > { %s23_s9 = sadd.s32 1, %s322_s7  ;;  %p267_p0 = scmp.ge.s32.totalorder %s326_s8, 1  ;;  %s326_s8 = sphi %s342_s8, %s11_s8   ;;  %s322_s7 = sphi %s340_s7, %s371_s7   ;;  %s318_s6 = sphi %s338_s6, %s370_s6  }
   0x3   : > { %p25_p1 = scmp.ge.s32.totalorder %s23_s9, 2  ;;  %p108_p2 = scmp.lt.s32.totalorder %s326_s8, 3 }
   0x5   : > { %s373_s9 = smov (%p25_p1, %s23_s9), 0  ;;  %p109_p3 = pnand %p267_p0, %p108_p2 }
   0x6   : > { %p137_p4 = scmp.lt.s32.totalorder (!%p109_p3), %s318_s6, 1  ;;  %v159_v0 = vlaneseq (!%p109_p3) }
   0x7   : > { %112 = sbr.rel (%p109_p3) target bundleno = 26 (0x1a), region = 24 }
   0x8   : > { %vm161_vm0 = vcmp.lt.s32.totalorder (!%p109_p3), %v159_v0, 256 }
   0xe   : > { %s375_s6 = smov (!%p137_p4, %s318_s6), 1 }
   0xf   : > { %s278_s10 = sshll.u32 %s375_s6, 3 }
  0x10   : > { %s144_s13 = scalar_lea.vmem %s368_s0, %s278_s10  ;;  %s154_s16 = scalar_lea.vmem %s369_s1, %s278_s10 }
  0x11   : > { %v156_v1 = vld [vmem:[%s144_s13] ss:$4 sm:$0x3]  ;;  %v272_v2 = vld [vmem:[%s144_s13 + $0x1] ss:$4 sm:$0x3] }
  0x12   : > { %v157_v3 = vmul.f32 4.844961, %v156_v1  ;;  %v166_v4 = vmul.f32 5.144033, %v272_v2 }
  0x13   : > { %v274_v5 = vld [vmem:[%s144_s13 + $0x2] ss:$4 sm:$0x3] }
  0x14   : > { %v158_v6 = vadd.f32 -1.3507752, %v157_v3  ;;  %v167_v7 = vadd.f32 -1.3667696, %v166_v4  ;;  %v172_v8 = vmul.f32 4.4404974, %v274_v5 }
  0x16   : > { %163 = vst.msk [vmem:[%s154_s16] ss:$4 sm:$0x3] %vm161_vm0, %v158_v6  ;;  %273 = vst.msk [vmem:[%s154_s16 + $0x1] ss:$4 sm:$0x3] %vm161_vm0, %v167_v7 }
  0x17   : > { %v173_v9 = vadd.f32 -1.1674068, %v172_v8 }
  0x19   : > { %275 = vst.msk [vmem:[%s154_s16 + $0x2] ss:$4 sm:$0x3] %vm161_vm0, %v173_v9 }
  0x1a PF: > { %s11_s8 = sadd.s32 1, %s326_s8   ;;  %s370_s6 = smov %s322_s7 }
  0x1b   : > { %p8_p5 = scmp.ge.s32.totalorder %s11_s8, 4   ;;  %s371_s7 = smov %s373_s9 }
  0x1d   :  { %10 = sbr.rel (!%p8_p5) target bundleno = 2 (0x2), region = 58 }

</bundles_post_ra>
